<compile_context>
chip_gen: v7x
topology: tpu7x:2x2x1
jax: 0.10.0
libtpu: 0.0.40
codegen_flags: <defaults>
</compile_context>

<pallas_src>
import jax
import jax.numpy as jnp
from jax.experimental import pallas as pl
from jax.experimental.pallas import tpu as pltpu


def _round_up(x, m):
    return (x + m - 1) // m * m


def _cdiv(a, b):
    return -(-a // b)


def _vmem_capacity_bytes():
    try:
        return int(pltpu.get_tpu_info().vmem_capacity_bytes)
    except Exception:
        return 64 * 1024 * 1024  # conservative: assume v7x-sized VMEM


# ---------------------------------------------------------------------------
# Kernels
# ---------------------------------------------------------------------------

def _make_fused_kernel(n_in):
    """out = sum_i x_i @ W_eff[i] + blin_eff.  Local f32 accumulation (no scratch)."""

    def kernel(*args):
        x_refs = args[:n_in]                       # n_in x (TM, d_model)
        weff_ref, blin_ref, o_ref = args[n_in:]
        acc = jnp.dot(x_refs[0][...], weff_ref[0],
                      preferred_element_type=jnp.float32)
        for i in range(1, n_in):                   # static, small
            acc = acc + jnp.dot(x_refs[i][...], weff_ref[i],
                                preferred_element_type=jnp.float32)
        o_ref[...] = (acc + blin_ref[...]).astype(o_ref.dtype)

    return kernel


def _make_two_stage_kernel(n_in, d_bot):
    """Stage 1 (only at the first N tile): bot_i = x_i @ Wbot_i^T written into a
    (TM, n_in*d_bot) VMEM scratch.  Stage 2: ONE MXU dot with K = n_in*d_bot so the
    cross-input accumulation happens inside the MXU instead of VPU adds."""

    def kernel(*args):
        x_refs = args[:n_in]                       # n_in x (TM, d_model)
        wbot_ref, wlin_ref, blin_ref, o_ref, bot_ref = args[n_in:]

        @pl.when(pl.program_id(1) == 0)            # stage-1 cached across N tiles
        def _():
            for i in range(n_in):                  # static, small
                bot = jnp.dot(x_refs[i][...], wbot_ref[i],
                              preferred_element_type=jnp.float32)
                bot_ref[:, i * d_bot:(i + 1) * d_bot] = bot.astype(bot_ref.dtype)

        acc = jnp.dot(bot_ref[...], wlin_ref[...],
                      preferred_element_type=jnp.float32)
        o_ref[...] = (acc + blin_ref[...]).astype(o_ref.dtype)

    return kernel


# ---------------------------------------------------------------------------
# Weight preparation (hoistable: call once if weights are static)
# ---------------------------------------------------------------------------

def prepare_bottleneck_params(wbots, bbots, wlin, blin, *, compute_dtype,
                              force_two_stage=False):
    """
    wbots: (n_in, d_bot, d_model)   -- torch Linear weight layout per bottleneck
    bbots: (n_in, d_bot)
    wlin : (d_model, n_in * d_bot)  -- torch Linear weight layout of final lin
    blin : (d_model,)
    """
    n_in, d_bot, d_model = wbots.shape
    # pad output lanes to a multiple of 128 -> unmasked lane-dense stores
    dmp = d_model if d_model % 128 == 0 else _round_up(d_model, 128)

    wlin_k = jnp.transpose(wlin, (1, 0)).reshape(n_in, d_bot, d_model)
    if dmp != d_model:
        wlin_k = jnp.pad(wlin_k, ((0, 0), (0, 0), (0, dmp - d_model)))
        blin_p = jnp.pad(blin, (0, dmp - d_model))
    else:
        blin_p = blin
    wlin_f32 = wlin_k.astype(jnp.float32)

    # fold bottleneck biases into the output bias (exact, in f32):
    blin_eff = (blin_p.astype(jnp.float32)
                + jnp.einsum('nb,nbm->m', bbots.astype(jnp.float32), wlin_f32)
                ).reshape(1, dmp)

    # Cycle-based crossover: two-stage's d_bot is padded to the 128-wide MXU anyway,
    # so per input it costs ~2*128*d_model MXU columns vs d_model*dmp for fused.
    # Fused only for small d_model (also keeps the fused weight tiny in VMEM and
    # satisfies v5e's ~d_model>=384 -> two-stage rule).
    use_fused = (not force_two_stage) and (d_bot < 128) and (d_model <= 256)

    if use_fused:
        # W_eff kept in f32 (exact fold; tiny since d_model <= 256).
        w_eff = jnp.einsum('nbd,nbm->ndm', wbots.astype(jnp.float32), wlin_f32)
        weights = (w_eff,)
    else:
        wbot_k = jnp.transpose(wbots, (0, 2, 1)).astype(compute_dtype)   # (n_in, d_model, d_bot)
        wlin_flat = wlin_k.reshape(n_in * d_bot, dmp).astype(compute_dtype)
        weights = (wbot_k, wlin_flat)

    return dict(mode="fused" if use_fused else "two_stage",
                weights=weights, blin_eff=blin_eff,
                n_in=n_in, d_bot=d_bot, d_model=d_model, dmp=dmp)


# ---------------------------------------------------------------------------
# Wrapper
# ---------------------------------------------------------------------------

def bottleneck_dense_pass(prev_outputs, wbots, bbots, wlin, blin, *,
                          tm_max=1024, force_two_stage=False, params=None):
    """
    prev_outputs: list of n_in arrays, each (batch, seq, d_model)
    returns: (batch, seq, d_model)
    """
    n_in = len(prev_outputs)
    batch, seq, d_model = prev_outputs[0].shape
    dtype = prev_outputs[0].dtype
    act_size = jnp.dtype(dtype).itemsize
    M = batch * seq

    if params is None:
        params = prepare_bottleneck_params(wbots, bbots, wlin, blin,
                                           compute_dtype=dtype,
                                           force_two_stage=force_two_stage)
    assert params["n_in"] == n_in and params["d_model"] == d_model
    d_bot, dmp = params["d_bot"], params["dmp"]
    blin_eff = params["blin_eff"]
    fused = params["mode"] == "fused"

    # generation-aware VMEM budgets (v5e/v6e: 128 MiB, v7x: 64 MiB)
    vmem_cap = _vmem_capacity_bytes()
    vmem_budget = int(vmem_cap * 0.70)
    vmem_limit = min(int(vmem_cap * 0.80), 128 * 1024 * 1024)

    # flatten activations (free reshape, no padding copy)
    xs = [p.reshape(M, d_model) for p in prev_outputs]

    if fused:
        (w_eff,) = params["weights"]
        w_size = jnp.dtype(w_eff.dtype).itemsize
        tn = dmp
        fixed = 2 * n_in * d_model * dmp * w_size + 2 * dmp * 4

        def per_tile(tm):
            return (2 * n_in * tm * d_model * act_size   # double-buffered x tiles
                    + 2 * tm * dmp * act_size            # double-buffered out tile
                    + tm * dmp * 4                       # f32 accumulator temps
                    + tm * d_model * 4)                  # x->f32 conversion temp
    else:
        wbot_k, wlin_flat = params["weights"]
        w_size = jnp.dtype(wbot_k.dtype).itemsize

        # Output-column (N) tiling caps resident wlin VMEM for large d_model.
        def fixed_for(tn_):
            return (2 * n_in * d_model * d_bot * w_size      # wbot (grid-invariant)
                    + 2 * n_in * d_bot * tn_ * w_size        # wlin column tile
                    + 2 * tn_ * 4)                           # bias tile

        tn = dmp
        while tn > 128 and fixed_for(tn) > vmem_budget // 3:
            tn = max(128, _round_up(tn // 2, 128))
        fixed = fixed_for(tn)

        def per_tile(tm):
            return (2 * n_in * tm * d_model * act_size       # x tiles
                    + 2 * tm * tn * act_size                 # out tile
                    + tm * n_in * d_bot * (act_size + 4)     # stage-1 scratch + f32 temp
                    + tm * tn * 4)                           # f32 accumulator temps
        # TODO(synk): if the bottleneck weights alone exceed VMEM (very large
        # d_model*d_bot), a K/d_bot tiling axis would also be needed.

    # ---- pick the M tile (multiple of 8) against the VMEM budget
    tm = max(8, min(tm_max, _round_up(M, 8)))
    while tm > 8 and fixed + per_tile(tm) > vmem_budget:
        tm = max(8, _round_up(tm // 2, 8))
    # v7x has two TensorCores: ensure the "parallel" M axis has >= 2 tiles to split.
    if _cdiv(M, tm) < 2 and M > 8:
        tm = max(8, _round_up(_cdiv(M, 2), 8))
    num_m = _cdiv(M, tm)
    num_n = _cdiv(dmp, tn)

    if fused:
        grid = (num_m,)
        x_spec = pl.BlockSpec((tm, d_model), lambda i: (i, 0))
        in_specs = ([x_spec] * n_in
                    + [pl.BlockSpec((n_in, d_model, dmp), lambda i: (0, 0, 0)),
                       pl.BlockSpec((1, dmp), lambda i: (0, 0))])
        out_spec = pl.BlockSpec((tm, dmp), lambda i: (i, 0))
        kernel = _make_fused_kernel(n_in)
        scratch = ()
        dims = ("parallel",)
        inputs = (*xs, params["weights"][0], blin_eff)
    else:
        # N innermost so the x tiles (index_map independent of j) are not re-fetched.
        grid = (num_m, num_n)
        x_spec = pl.BlockSpec((tm, d_model), lambda i, j: (i, 0))
        in_specs = ([x_spec] * n_in
                    + [pl.BlockSpec((n_in, d_model, d_bot), lambda i, j: (0, 0, 0)),
                       pl.BlockSpec((n_in * d_bot, tn), lambda i, j: (0, j)),
                       pl.BlockSpec((1, tn), lambda i, j: (0, j))])
        out_spec = pl.BlockSpec((tm, tn), lambda i, j: (i, j))
        kernel = _make_two_stage_kernel(n_in, d_bot)
        scratch = (pltpu.VMEM((tm, n_in * d_bot), dtype),)
        dims = ("parallel", "arbitrary")
        inputs = (*xs, params["weights"][0], params["weights"][1], blin_eff)

    out = pl.pallas_call(
        kernel,
        out_shape=jax.ShapeDtypeStruct((M, dmp), dtype),
        grid=grid,
        in_specs=in_specs,
        out_specs=out_spec,
        scratch_shapes=scratch,
        compiler_params=pltpu.CompilerParams(
            dimension_semantics=dims,
            vmem_limit_bytes=vmem_limit,
        ),
    )(*inputs)

    if dmp != d_model:
        out = out[:, :d_model]
    return out.reshape(batch, seq, d_model)


# ---------------------------------------------------------------------------
# Pure-JAX reference (mirrors the PyTorch module)
# ---------------------------------------------------------------------------

def _reference(prev_outputs, wbots, bbots, wlin, blin):
    bots = [p @ wbots[i].T + bbots[i] for i, p in enumerate(prev_outputs)]
    cat = jnp.concatenate(bots, axis=-1)
    return cat @ wlin.T + blin


if __name__ == "__main__":
    batch, seq, d_model = 2, 8, 32
    n_in = 3
    bottleneck_ratio = 4
    d_bot = d_model // bottleneck_ratio  # 8

    key = jax.random.PRNGKey(0)
    keys = jax.random.split(key, n_in + 4)

    prev_outputs = [
        jax.random.normal(keys[i], (batch, seq, d_model), dtype=jnp.float32)
        for i in range(n_in)
    ]
    kb = 1.0 / jnp.sqrt(jnp.float32(d_model))
    wbots = jax.random.uniform(keys[n_in], (n_in, d_bot, d_model),
                               minval=-kb, maxval=kb, dtype=jnp.float32)
    bbots = jax.random.uniform(keys[n_in + 1], (n_in, d_bot),
                               minval=-kb, maxval=kb, dtype=jnp.float32)
    kl = 1.0 / jnp.sqrt(jnp.float32(d_bot * n_in))
    wlin = jax.random.uniform(keys[n_in + 2], (d_model, d_bot * n_in),
                              minval=-kl, maxval=kl, dtype=jnp.float32)
    blin = jax.random.uniform(keys[n_in + 3], (d_model,),
                              minval=-kl, maxval=kl, dtype=jnp.float32)

    y_ref = _reference(prev_outputs, wbots, bbots, wlin, blin)

    # 1) default (fused) path: d_model<=256 -> fused; exercises >=2 M tiles + lane padding
    y1 = jax.block_until_ready(bottleneck_dense_pass(prev_outputs, wbots, bbots, wlin, blin))
    assert y1.shape == (batch, seq, d_model)
    assert jnp.allclose(y1, y_ref, atol=2e-5, rtol=2e-5), "fused path mismatch"

    # 2) two-stage path via hoisted weight prep (the path large-d_model configs take)
    params_ts = prepare_bottleneck_params(wbots, bbots, wlin, blin,
                                          compute_dtype=jnp.float32,
                                          force_two_stage=True)
    y2 = jax.block_until_ready(bottleneck_dense_pass(prev_outputs, wbots, bbots, wlin, blin,
                                                     params=params_ts))
    assert jnp.allclose(y2, y_ref, atol=2e-5, rtol=2e-5), "two-stage path mismatch"

    # 3) ragged M (partial last tile, no wrapper-side activation padding) — fused
    seq_odd = 5
    prev_odd = [p[:, :seq_odd] for p in prev_outputs]
    y3_ref = _reference(prev_odd, wbots, bbots, wlin, blin)
    y3 = jax.block_until_ready(bottleneck_dense_pass(prev_odd, wbots, bbots, wlin, blin))
    assert y3.shape == (batch, seq_odd, d_model)
    assert jnp.allclose(y3, y3_ref, atol=2e-5, rtol=2e-5), "ragged-M fused mismatch"

    # 4) ragged M — two-stage
    y4 = jax.block_until_ready(bottleneck_dense_pass(prev_odd, wbots, bbots, wlin, blin,
                                                     params=params_ts))
    assert jnp.allclose(y4, y3_ref, atol=2e-5, rtol=2e-5), "ragged-M two-stage mismatch"

    print("KERNEL_OK")
</pallas_src>

<mosaic_0001>
module attributes {stable_mosaic.version = 11 : i64} {
  func.func @kernel(%arg0: i32, %arg1: memref<8x32xf32, #tpu.memory_space<vmem>>, %arg2: memref<8x32xf32, #tpu.memory_space<vmem>>, %arg3: memref<8x32xf32, #tpu.memory_space<vmem>>, %arg4: memref<3x32x128xf32, #tpu.memory_space<vmem>>, %arg5: memref<1x128xf32, #tpu.memory_space<vmem>>, %arg6: memref<8x128xf32, #tpu.memory_space<vmem>>) attributes {dimension_semantics = [#tpu.dimension_semantics<parallel>], iteration_bounds = array<i64: 2>, scalar_prefetch = 0 : i64, scratch_operands = 0 : i64, tpu.core_type = #tpu.core_type<tc>, window_params = [{transform_indices = @transform_0, window_bounds = array<i64: 8, 32>}, {transform_indices = @transform_1, window_bounds = array<i64: 8, 32>}, {transform_indices = @transform_2, window_bounds = array<i64: 8, 32>}, {pipeline_mode = #tpu.pipeline_mode<synchronous>, transform_indices = @transform_3, window_bounds = array<i64: 3, 32, 128>}, {pipeline_mode = #tpu.pipeline_mode<synchronous>, transform_indices = @transform_4, window_bounds = array<i64: 1, 128>}, {transform_indices = @transform_5, window_bounds = array<i64: 8, 128>}]} {
    %c0 = arith.constant 0 : index
    %c0_0 = arith.constant 0 : index
    %0 = vector.load %arg1[%c0, %c0_0] : memref<8x32xf32, #tpu.memory_space<vmem>>, vector<8x32xf32>
    %c0_1 = arith.constant 0 : index
    %c0_2 = arith.constant 0 : index
    %c0_3 = arith.constant 0 : index
    %1 = vector.load %arg4[%c0_1, %c0_2, %c0_3] : memref<3x32x128xf32, #tpu.memory_space<vmem>>, vector<1x32x128xf32>
    %2 = vector.shape_cast %1 : vector<1x32x128xf32> to vector<32x128xf32>
    %cst = arith.constant dense<0.000000e+00> : vector<8x128xf32>
    %3 = tpu.matmul %0, %2, %cst {dimension_numbers = #tpu.dot_dimension_numbers<[1], [0], [0], [1], [0, 0, 1, 1], [], []>} : vector<8x32xf32>, vector<32x128xf32>, vector<8x128xf32> -> vector<8x128xf32>
    %c0_4 = arith.constant 0 : index
    %c0_5 = arith.constant 0 : index
    %4 = vector.load %arg2[%c0_4, %c0_5] : memref<8x32xf32, #tpu.memory_space<vmem>>, vector<8x32xf32>
    %c1 = arith.constant 1 : index
    %c0_6 = arith.constant 0 : index
    %c0_7 = arith.constant 0 : index
    %5 = vector.load %arg4[%c1, %c0_6, %c0_7] : memref<3x32x128xf32, #tpu.memory_space<vmem>>, vector<1x32x128xf32>
    %6 = vector.shape_cast %5 : vector<1x32x128xf32> to vector<32x128xf32>
    %cst_8 = arith.constant dense<0.000000e+00> : vector<8x128xf32>
    %7 = tpu.matmul %4, %6, %cst_8 {dimension_numbers = #tpu.dot_dimension_numbers<[1], [0], [0], [1], [0, 0, 1, 1], [], []>} : vector<8x32xf32>, vector<32x128xf32>, vector<8x128xf32> -> vector<8x128xf32>
    %8 = arith.addf %3, %7 : vector<8x128xf32>
    %c0_9 = arith.constant 0 : index
    %c0_10 = arith.constant 0 : index
    %9 = vector.load %arg3[%c0_9, %c0_10] : memref<8x32xf32, #tpu.memory_space<vmem>>, vector<8x32xf32>
    %c2 = arith.constant 2 : index
    %c0_11 = arith.constant 0 : index
    %c0_12 = arith.constant 0 : index
    %10 = vector.load %arg4[%c2, %c0_11, %c0_12] : memref<3x32x128xf32, #tpu.memory_space<vmem>>, vector<1x32x128xf32>
    %11 = vector.shape_cast %10 : vector<1x32x128xf32> to vector<32x128xf32>
    %cst_13 = arith.constant dense<0.000000e+00> : vector<8x128xf32>
    %12 = tpu.matmul %9, %11, %cst_13 {dimension_numbers = #tpu.dot_dimension_numbers<[1], [0], [0], [1], [0, 0, 1, 1], [], []>} : vector<8x32xf32>, vector<32x128xf32>, vector<8x128xf32> -> vector<8x128xf32>
    %13 = arith.addf %8, %12 : vector<8x128xf32>
    %c0_14 = arith.constant 0 : index
    %c0_15 = arith.constant 0 : index
    %14 = vector.load %arg5[%c0_14, %c0_15] : memref<1x128xf32, #tpu.memory_space<vmem>>, vector<1x128xf32>
    %15 = vector.broadcast %14 : vector<1x128xf32> to vector<8x128xf32>
    %16 = arith.addf %13, %15 : vector<8x128xf32>
    %c0_16 = arith.constant 0 : index
    %c0_17 = arith.constant 0 : index
    %17 = vector.load %arg6[%c0_16, %c0_17] : memref<8x128xf32, #tpu.memory_space<vmem>>, vector<8x128xf32>
    tpu.vector_store %arg6[%c0_16, %c0_17], %16 {strides = array<i32>} : memref<8x128xf32, #tpu.memory_space<vmem>>, vector<8x128xf32>,
    return
  }
  func.func @transform_0(%arg0: i32) -> (i32, i32) {
    %c0_i32 = arith.constant 0 : i32
    %c0_i32_0 = arith.constant 0 : i32
    return %arg0, %c0_i32 : i32, i32
  }
  func.func @transform_1(%arg0: i32) -> (i32, i32) {
    %c0_i32 = arith.constant 0 : i32
    %c0_i32_0 = arith.constant 0 : i32
    return %arg0, %c0_i32 : i32, i32
  }
  func.func @transform_2(%arg0: i32) -> (i32, i32) {
    %c0_i32 = arith.constant 0 : i32
    %c0_i32_0 = arith.constant 0 : i32
    return %arg0, %c0_i32 : i32, i32
  }
  func.func @transform_3(%arg0: i32) -> (i32, i32, i32) {
    %c0_i32 = arith.constant 0 : i32
    %c0_i32_0 = arith.constant 0 : i32
    %c0_i32_1 = arith.constant 0 : i32
    %c0_i32_2 = arith.constant 0 : i32
    return %c0_i32, %c0_i32_0, %c0_i32_1 : i32, i32, i32
  }
  func.func @transform_4(%arg0: i32) -> (i32, i32) {
    %c0_i32 = arith.constant 0 : i32
    %c0_i32_0 = arith.constant 0 : i32
    %c0_i32_1 = arith.constant 0 : i32
    return %c0_i32, %c0_i32_0 : i32, i32
  }
  func.func @transform_5(%arg0: i32) -> (i32, i32) {
    %c0_i32 = arith.constant 0 : i32
    %c0_i32_0 = arith.constant 0 : i32
    return %arg0, %c0_i32 : i32, i32
  }
}

</mosaic_0001>

<bundles_post_ra>
// kernel: tpu_custom_call.1
= control target key start
LH: loop header
LB: loop body
LE: loop exit
PB: predicated region body
PF: predicated region fallthrough
CT: control target
= control target key end

     0   :  { %s1400_s0 = inlined_call_operand.hbm [shape: f32[16,32], index: 0, kind: input, shape index: {}]   ;;  %s1401_s1 = inlined_call_operand.hbm [shape: f32[16,32], index: 1, kind: input, shape index: {}]   ;;  %s1402_s2 = inlined_call_operand.hbm [shape: f32[16,32], index: 2, kind: input, shape index: {}]   ;;  %s1403_s3 = inlined_call_operand.hbm [shape: f32[3,32,128], index: 3, kind: input, shape index: {}]   ;;  %s1404_s4 = inlined_call_operand.vmem [shape: f32[1,128], index: 4, kind: input, shape index: {}]   ;;  %s1405_s5 = inlined_call_operand.hbm [shape: f32[16,128], index: 5, kind: output, shape index: {}]  }
   0x1   :  { %1422 = sst [smem:[#allocation20_spill]] %s1401_s1 }
   0x2   :  { %1423 = sst [smem:[#allocation21_spill]] %s1405_s5 }
   0x3   :  { %10 = vsyncpa [#allocation3], 0 }
   0x4   :  { %12 = vsyncpa [#allocation3 + $0x1], 0 }
   0x5   :  { %13 = vsyncpa [#allocation6], 0 }
   0x6   :  { %15 = vsyncpa [#allocation6 + $0x1], 0 }
   0x7   :  { %16 = vsyncpa [#allocation9], 0 }
   0x8   :  { %17 = vsyncpa [#allocation4], 0 }
   0x9   :  { %19 = vsyncpa [#allocation4 + $0x1], 0  ;;  %s1106_s18 = smov 0   ;;  %s1108_s19 = smov 0  }
   0xa   :  { %s1110_s20 = smov 0   ;;  %s1112_s21 = smov 0  }
   0xb LB: > { %1424 = sst [smem:[#allocation15_spill]] %s1052_s18  ;;  %s1127_s22 = sadd.s32 1, %s1064_s21   ;;  %s1064_s21 = sphi %s1112_s21, %s1453_s21   ;;  %s1060_s20 = sphi %s1110_s20, %s1457_s20   ;;  %s1056_s19 = sphi %s1108_s19, %s1456_s19   ;;  %s1052_s18 = sphi %s1106_s18, %s1455_s18  }
   0xc   : > { %1425 = sst [smem:[#allocation16_spill]] %s1064_s21  ;;  %s32_s23 = sadd.s32 1, %s1060_s20 }
   0xd   : > { %1426 = sst [smem:[#allocation17_spill]] %s1127_s22  ;;  %s29_s24 = ssub.s32 %s1064_s21, %s1127_s22 }
   0xe   : > { %p1406_p0 = scmp.ne.s32.totalorder %s1060_s20, %s1056_s19  ;;  %p30_p1 = scmp.eq.s32.totalorder %s29_s24, 0 }
   0xf   : > { %p40_p2 = scmp.eq.s32.totalorder %s1064_s21, 0  ;;  %p831_p4 = scmp.lt.s32.totalorder %s1064_s21, 2 }
  0x10   : > { %s1138_s25 = scalar_select %p30_p1, %s1060_s20, %s32_s23  }
  0x11   : > { %p41_p5 = por %p40_p2, %p1406_p0  ;;  %s1407_s26 = sand.u32 1, %s1060_s20  }
  0x12   : > { %1427 = sst [smem:[#allocation18_spill]] %s1138_s25  ;;  %s1146_s27 = sshll.u32 %s1407_s26, 3 }
  0x13   : > { %s1149_s28 = sshll.u32 %s1064_s21, 7  ;;  %p1151_p6 = pnand %p831_p4, %p41_p5 }
  0x14   : > { %s223_s30 = sand.u32 1, %s1064_s21   ;;  %s1429_s1 = sld [smem:[#allocation20_spill]] }
  0x15   : > { %s1428_s29 = scalar_select %p1151_p6, 1, 0 }
  0x16   : > { %s227_s9 = scalar_lea.vmem [#allocation5], %s1146_s27  ;;  %s1165_s11 = scalar_lea.sflag [#allocation6], %s223_s30 }
  0x17   : > { %s234_s10 = sshll.u32 %s227_s9, 4  ;;  %p1171_p8 = pneg %p1151_p6  ;;  %s1163_s10 = int_to_ptr.vmem [resolvable:$true] %s234_s10 }
  0x19   : > { %s1430_s13 = scalar_select %p1171_p8, 1, 0 }
  0x1a   : > { %s1160_s8 = scalar_lea.hbm %s1429_s1, %s1149_s28  ;;  %s877_s16 = scalar_lea.hbm %s1429_s1, 256 }
  0x1b   : > { %s872_s12 = scalar_lea.hbm %s1160_s8, 128  ;;  %p878_p11 = scmp.lt.u32.totalorder %s1160_s8, %s1429_s1 }
  0x1c   : > { %p873_p7 = scmp.ne.s32.totalorder %s1160_s8, %s872_s12  ;;  %p879_p12 = scmp.lt.u32.totalorder %s877_s16, %s872_s12 }
  0x1d   : > { %p881_p1 = scmp.lt.u32.totalorder %s872_s12, %s1160_s8 }
  0x1e   : > { %p875_p9 = pnand %p1171_p8, %p873_p7  ;;  %p880_p13 = por %p879_p12, %p878_p11 }
  0x20   : > { %p876_p10 = pneg %p875_p9  ;;  %p882_p2 = por %p881_p1, %p880_p13 }
  0x22   : > { %p883_p4 = pnand %p882_p2, %p876_p10 }
  0x24   : > { %886 = shalt.err (!%p883_p4)
}
  0x25   : > { %s887_s24 = scalar_lea.vmem %s1163_s10, 128  ;;  %s1066_s30 = smov [#allocation5]  }
  0x26   : > { %p888_p5 = scmp.ne.s32.totalorder %s1163_s10, %s887_s24  ;;  %s892_s6 = sshll.u32 %s1066_s30, 4  ;;  %s893_s6 = int_to_ptr.vmem [resolvable:$false] %s892_s6 }
  0x27   : > { %s894_s7 = scalar_lea.vmem %s893_s6, 256  ;;  %p895_p3 = scmp.lt.s32.totalorder %s1163_s10, %s893_s6 }
  0x28   : > { %p890_p7 = pnand %p888_p5, %p1171_p8  ;;  %p896_p0 = scmp.lt.s32.totalorder %s894_s7, %s887_s24 }
  0x2a   : > { %p891_p9 = pneg %p890_p7  ;;  %p897_p11 = por %p896_p0, %p895_p3 }
  0x2c   : > { %p898_p12 = pnand %p897_p11, %p891_p9 }
  0x2e   : > { %901 = shalt.err (!%p898_p12)
}
  0x2f   : > { %822 = dma.hbm_to_vmem [thread:$0]  (!%p1151_p6), %s1160_s8, 128, %s1163_s10, %s1165_s11  }
  0x30   : > { %s1196_s9 = sadd.s32 4294967295, %s1064_s21   ;;  %s710_s12 = sadd.s32 4294967294, %s1064_s21  }
  0x31   : > { %p45_p0 = scmp.ne.s32.totalorder %s1056_s19, %s1052_s18  ;;  %p1412_p3 = scmp.eq.s32.totalorder %s1196_s9, 0 }
  0x32   : > { %p163_p10 = scmp.eq.s32.totalorder %s1196_s9, 1  ;;  %p169_p13 = scmp.eq.s32.totalorder %s710_s12, 1 }
  0x33   : > { %p1205_p1 = por %p1412_p3, %p45_p0  ;;  %p711_p2 = scmp.ge.s32.totalorder %s1064_s21, 1 }
  0x34   : > { %p1432_p4 = scmp.ne.s32.totalorder %s1060_s20, %s1056_s19  ;;  %p1217_p7 = por %p169_p13, %p45_p0 }
  0x35   : > { %s1431_s14 = scalar_select %p1205_p1, 1, 0 }
  0x36   : > { %p1213_p5 = por %p163_p10, %p1432_p4  ;;  %p176_p9 = scmp.lt.s32.totalorder %s1064_s21, 3 }
  0x37   : > { %s1434_s10 = scalar_select %p1217_p7, 1, 0 }
  0x38   : > { %s1433_s8 = scalar_select %p1213_p5, 1, 0 }
  0x39   : > { %1435 = sst [smem:[#allocation19_spill]] %s1434_s10  ;;  %p1222_p11 = pnand %p711_p2, %p176_p9 }
  0x3a   : > { %s1067_s16 = smov [#allocation8]   ;;  %s1234_s30 = scalar_lea.hbm %s1400_s0, %s1149_s28 }
  0x3b   : > { %s1436_s15 = scalar_select %p1222_p11, 1, 0 }
  0x3c   : > { %s188_s17 = sshll.u32 %s1067_s16, 4  ;;  %p812_p12 = pneg %p1222_p11  ;;  %s1226_s17 = int_to_ptr.vmem [resolvable:$true] %s188_s17 }
  0x3d   : > { %s209_s7 = scalar_lea.vmem [#allocation2], %s1146_s27  ;;  %s1249_s1 = scalar_lea.hbm %s1402_s2, %s1149_s28 }
  0x3e   : > { %p1238_p0 = pnand %p812_p12, %p1412_p3  ;;  %s216_s12 = sshll.u32 %s209_s7, 4  ;;  %s1243_s12 = int_to_ptr.vmem [resolvable:$true] %s216_s12 }
  0x3f   : > { %s902_s23 = scalar_lea.hbm %s1403_s3, 1536 }
  0x40   : > { %p903_p10 = scmp.ne.s32.totalorder %s1403_s3, %s902_s23  ;;  %p904_p13 = pneg %p1238_p0 }
  0x41   : > { %p909_p9 = scmp.lt.u32.totalorder %s902_s23, %s1403_s3 }
  0x42   : > { %p905_p2 = pnand %p904_p13, %p903_p10 }
  0x44   : > { %p906_p4 = pneg %p905_p2 }
  0x46   : > { %p911_p12 = pnand %p909_p9, %p906_p4 }
  0x48   : > { %914 = shalt.err (!%p911_p12)
}
  0x49   : > { %s915_s26 = scalar_lea.vmem %s1226_s17, 1536  ;;  %p923_p1 = scmp.lt.s32.totalorder %s1226_s17, %s1226_s17 }
  0x4a   : > { %p916_p3 = scmp.ne.s32.totalorder %s1226_s17, %s915_s26  ;;  %p924_p11 = scmp.lt.s32.totalorder %s915_s26, %s915_s26 }
  0x4c   : > { %p918_p7 = pnand %p916_p3, %p904_p13  ;;  %p925_p6 = por %p924_p11, %p923_p1 }
  0x4e   : > { %p919_p5 = pneg %p918_p7 }
  0x50   : > { %p926_p8 = pnand %p925_p6, %p919_p5 }
  0x52   : > { %929 = shalt.err (!%p926_p8)
}
  0x53   : > { %s1068_s21 = smov 128   ;;  %s1069_s22 = smov 8  }
  0x54   : > { %815 = dma.hbm_to_vmem [thread:$0]  (!%p1238_p0), %s1403_s3, 1536, %s1226_s17, [#allocation9], %s1068_s21, %s1068_s21, %s1069_s22  }
  0x55   : > { %s1438_s10 = sand.u32 1, %s1060_s20   ;;  %s930_s23 = scalar_lea.hbm %s1234_s30, 128 }
  0x56   : > { %s206_s16 = scalar_lea.sflag [#allocation3], %s1438_s10  ;;  %p931_p6 = scmp.ne.s32.totalorder %s1234_s30, %s930_s23 }
  0x57   : > { %p1439_p8 = scmp.ne.s32.totalorder %s1430_s13, 0  ;;  %s935_s26 = scalar_lea.hbm %s1400_s0, 256 }
  0x58   : > { %p936_p5 = scmp.lt.u32.totalorder %s1234_s30, %s1400_s0  ;;  %p937_p7 = scmp.lt.u32.totalorder %s935_s26, %s930_s23 }
  0x59   : > { %p933_p3 = pnand %p931_p6, %p1439_p8  ;;  %p939_p10 = scmp.lt.u32.totalorder %s930_s23, %s1234_s30 }
  0x5a   : > { %p938_p11 = por %p937_p7, %p936_p5 }
  0x5b   : > { %p934_p1 = pneg %p933_p3 }
  0x5c   : > { %p940_p13 = por %p939_p10, %p938_p11 }
  0x5e   : > { %p941_p0 = pnand %p940_p13, %p934_p1 }
  0x60   : > { %944 = shalt.err (!%p941_p0)
}
  0x61   : > { %s945_s17 = scalar_lea.vmem %s1243_s12, 128  ;;  %s1070_s6 = smov [#allocation2]  }
  0x62   : > { %p946_p2 = scmp.ne.s32.totalorder %s1243_s12, %s945_s17  ;;  %s950_s21 = sshll.u32 %s1070_s6, 4  ;;  %s951_s21 = int_to_ptr.vmem [resolvable:$false] %s950_s21 }
  0x63   : > { %s952_s5 = scalar_lea.vmem %s951_s21, 256  ;;  %p953_p12 = scmp.lt.s32.totalorder %s1243_s12, %s951_s21 }
  0x64   : > { %p948_p4 = pnand %p946_p2, %p1439_p8  ;;  %p954_p6 = scmp.lt.s32.totalorder %s952_s5, %s945_s17 }
  0x66   : > { %p949_p9 = pneg %p948_p4  ;;  %p955_p3 = por %p954_p6, %p953_p12 }
  0x68   : > { %p956_p5 = pnand %p955_p3, %p949_p9 }
  0x6a   : > { %959 = shalt.err (!%p956_p5)
}
  0x6b   : > { %p1440_p1 = scmp.ne.s32.totalorder %s1428_s29, 0  ;;  %s245_s18 = scalar_lea.vmem [#allocation7], %s1146_s27 }
  0x6c   : > { %s252_s22 = sshll.u32 %s245_s18, 4  ;;  %s960_s25 = scalar_lea.hbm %s1249_s1, 128  ;;  %s253_s22 = int_to_ptr.vmem [resolvable:$true] %s252_s22 }
  0x6d   : > { %819 = dma.hbm_to_vmem [thread:$0]  (!%p1440_p1), %s1234_s30, 128, %s1243_s12, %s206_s16  }
  0x6e   : > { %p961_p7 = scmp.ne.s32.totalorder %s1249_s1, %s960_s25  ;;  %s965_s23 = scalar_lea.hbm %s1402_s2, 256 }
  0x6f   : > { %p966_p13 = scmp.lt.u32.totalorder %s1249_s1, %s1402_s2  ;;  %p967_p0 = scmp.lt.u32.totalorder %s965_s23, %s960_s25 }
  0x70   : > { %p963_p11 = pnand %p961_p7, %p1439_p8  ;;  %p969_p4 = scmp.lt.u32.totalorder %s960_s25, %s1249_s1 }
  0x71   : > { %p968_p2 = por %p967_p0, %p966_p13 }
  0x72   : > { %p964_p10 = pneg %p963_p11 }
  0x73   : > { %p970_p9 = por %p969_p4, %p968_p2 }
  0x75   : > { %p971_p12 = pnand %p970_p9, %p964_p10 }
  0x77   : > { %974 = shalt.err (!%p971_p12)
}
  0x78   : > { %s975_s27 = scalar_lea.vmem %s253_s22, 128  ;;  %s1071_s30 = smov [#allocation7]  }
  0x79   : > { %p976_p6 = scmp.ne.s32.totalorder %s253_s22, %s975_s27  ;;  %s980_s12 = sshll.u32 %s1071_s30, 4  ;;  %s981_s12 = int_to_ptr.vmem [resolvable:$false] %s980_s12 }
  0x7a   : > { %s982_s16 = scalar_lea.vmem %s981_s12, 256  ;;  %p983_p7 = scmp.lt.s32.totalorder %s253_s22, %s981_s12 }
  0x7b   : > { %p978_p3 = pnand %p976_p6, %p1439_p8  ;;  %p984_p11 = scmp.lt.s32.totalorder %s982_s16, %s975_s27 }
  0x7d   : > { %p979_p5 = pneg %p978_p3  ;;  %p985_p1 = por %p984_p11, %p983_p7 }
  0x7f   : > { %p986_p0 = pnand %p985_p1, %p979_p5 }
  0x81   : > { %989 = shalt.err (!%p986_p0)
}
  0x82   : > { %p1441_p13 = scmp.ne.s32.totalorder %s1428_s29, 0  ;;  %p1442_p10 = scmp.ne.s32.totalorder %s1436_s15, 0 }
  0x83   : > { %s1317_s13 = sand.u32 (!%p1442_p10), 1, %s1056_s19   ;;  %p1443_p8 = scmp.ne.s32.totalorder (!%p1442_p10), %s1431_s14, 0 }
  0x84   : > { %825 = dma.hbm_to_vmem [thread:$0]  (!%p1441_p13), %s1249_s1, 128, %s253_s22, %s1165_s11  }
  0x85   : > { %261 = sbr.rel (%p1442_p10) target bundleno = 395 (0x18b), region = 40  ;;  %s1320_s26 = sshll.u32 (!%p1442_p10), %s1317_s13, 3 }
  0x86   : > { %s264_s17 = scalar_lea.sflag (!%p1442_p10), [#allocation3], %s1317_s13  ;;  %s267_s6 = scalar_lea.vmem (!%p1442_p10), [#allocation2], %s1320_s26 }
  0x8c   : > { %1035 = dma.done.wait (%p1443_p8), %s264_s17, 128  }
  0x8d   : > { %1037 = vsyncadd (%p1443_p8), %s264_s17, 4294967168  ;;  %s272_s1 = sand.u32 1, %s1196_s9   ;;  %s276_s11 = scalar_lea.vmem [#allocation5], %s1320_s26 }
  0x8e   : > { %s273_s29 = scalar_lea.sflag [#allocation6], %s272_s1 }
  0x8f   : > { %1039 = dma.done.wait (%p1443_p8), %s273_s29, 256  }
  0x90   : > { %1041 = vsyncadd (%p1443_p8), %s273_s29, 4294967040  ;;  %s285_s15 = scalar_lea.vmem [#allocation7], %s1320_s26  ;;  %p1444_p1 = scmp.eq.s32.totalorder %s1196_s9, 0 }
  0x92   : > { %1043 = dma.done.wait (%p1444_p1), [#allocation9], 1536   ;;  %p1445_p2 = pmov %p1444_p1 }
  0x93   : > { %v1072_v0 = vmov 0.0|0.0   ;;  %vm1073_vm0 = vmmov 0   ;;  %v1074_v1 = vmov 0.0   ;;  %v333_v2 = vld [vmem:[#allocation8 + $0x20] sm:$0xff]  ;;  %v334_v3 = vld [vmem:[#allocation8 + $0x28] sm:$0xff]  ;;  %v335_v7 = vld [vmem:[#allocation8 + $0x30] sm:$0xff] }
  0x94   : > { %1045 = vsyncadd (%p1445_p2), [#allocation9], 4294965760  ;;  %782 = vmatprep.subr.bf16.mxu0 %v1072_v0  ;;  %788 = vmatprep.subr.bf16.mxu1 %v1072_v0  ;;  %v327_v4 = vld [vmem:[#allocation8] sm:$0xff]  ;;  %v783_v5 = vpack.c.bf16 %v334_v3, %v333_v2  ;;  %v328_v6 = vld [vmem:[#allocation8 + $0x8] sm:$0xff]  ;;  %vm337_vm1 = vcmask 261120   ;;  %s731_s5 = sshll.u32 %s1196_s9, 7 }
  0x95   : > { %757 = vmatprep.mubr.msk.f32.mxu0 %vm1073_vm0, %v1074_v1  ;;  %768 = vmatprep.mubr.msk.f32.mxu1 %vm1073_vm0, %v1074_v1  ;;  %v336_v8 = vld [vmem:[#allocation8 + $0x38] sm:$0xff]  ;;  %v789_v9 = vpack.c.bf16 %v328_v6, %v327_v4  ;;  %v329_v10 = vld [vmem:[#allocation8 + $0x10] sm:$0xff]  ;;  %v486_v14 = vld [vmem:[#allocation8 + $0x40] sm:$0xff]  ;;  %s325_s18 = scalar_lea.vmem [#allocation10], %s1320_s26  ;;  %s1446_s10 = sld [smem:[#allocation21_spill]] }
  0x96   : > { %v330_v11 = vld [vmem:[#allocation8 + $0x18] sm:$0xff]  ;;  %784 = vmatpush3.bf16.msra.mxu0 %v783_v5  ;;  %v786_v12 = vpack.c.bf16 %v336_v8, %v335_v7  ;;  %v487_v15 = vld [vmem:[#allocation8 + $0x48] sm:$0xff]  ;;  %v488_v19 = vld [vmem:[#allocation8 + $0x50] sm:$0xff]  ;;  %s587_s22 = sshll.u32 %s325_s18, 4  ;;  %s574_s24 = scalar_lea.sflag [#allocation4], %s1317_s13  ;;  %s1358_s22 = int_to_ptr.vmem [resolvable:$true] %s587_s22 }
  0x97   : > { %790 = vmatpush3.bf16.msra.mxu1 %v789_v9  ;;  %785 = vmatprep.subr.bf16.mxu0 %v1072_v0  ;;  %v792_v13 = vpack.c.bf16 %v330_v11, %v329_v10  ;;  %v331_v16 = vld [vmem:[%s276_s11] sm:$0xff]  ;;  %v795_v17 = vpack.c.bf16 %v487_v15, %v486_v14  ;;  %v326_v18 = vld [vmem:[%s267_s6] sm:$0xff]  ;;  %s990_s7 = scalar_lea.vmem %s1358_s22, 128  ;;  %p1447_p9 = scmp.ne.s32.totalorder %s1433_s8, 0 }
  0x98   : > { %791 = vmatprep.subr.bf16.mxu1 %v1072_v0  ;;  %v489_v20 = vld [vmem:[#allocation8 + $0x58] sm:$0xff]  ;;  %v729_v29 = vld [vmem:[%s1404_s4] ss:$0 sm:$0xff]  ;;  %p991_p4 = scmp.ne.s32.totalorder %s1358_s22, %s990_s7  ;;  %s1075_s9 = smov [#allocation10]  }
  0x99   : > { %v798_v21 = vpack.c.bf16 %v489_v20, %v488_v19  ;;  %v484_v22 = vld [vmem:[%s285_s15] sm:$0xff]  ;;  %s994_s27 = sshll.u32 %s1075_s9, 4  ;;  %s995_s27 = int_to_ptr.vmem [resolvable:$false] %s994_s27 }
  0x9a   : > { %787 = vmatpush3.bf16.msra.mxu0 %v786_v12  ;;  %p992_p12 = pnand %p991_p4, %p1447_p9  ;;  %s996_s30 = scalar_lea.vmem %s995_s27, 256 }
  0x9b   : > { %793 = vmatpush3.bf16.msra.mxu1 %v792_v13  ;;  %794 = vmatprep.subr.bf16.mxu0 %v1072_v0  ;;  %s1356_s23 = scalar_lea.hbm %s1446_s10, %s731_s5  ;;  %p997_p3 = scmp.lt.s32.totalorder %s1358_s22, %s995_s27 }
  0x9c   : > { %p993_p6 = pneg %p992_p12  ;;  %p998_p5 = scmp.lt.s32.totalorder %s996_s30, %s990_s7 }
  0x9d   : > { %758 = vmatmul.mubr.msk.f32.vlgmr.msra.gmra.mrb[0].mxu0 %vm337_vm1, %v331_v16 }
  0x9e   : > { %769 = vmatmul.mubr.msk.f32.vlgmr.msra.gmra.mrb[0].mxu1 %vm337_vm1, %v326_v18  ;;  %796 = vmatpush3.bf16.msra.mxu0 %v795_v17  ;;  %p999_p7 = por %p998_p5, %p997_p3 }
  0x9f   : > { %797 = vmatprep.subr.bf16.mxu0 %v1072_v0  ;;  %779 = vmatprep.mubr.msk.f32.mxu0 %vm1073_vm0, %v1074_v1 }
  0xa0   : > { %p1000_p11 = pnand %p999_p7, %p993_p6 }
  0xa2   : > { %799 = vmatpush3.bf16.msra.mxu0 %v798_v21 }
  0xa5   : > { %780 = vmatmul.mubr.msk.f32.vlgmr.msra.gmra.mrb[2].mxu0 %vm337_vm1, %v484_v22 }
 0x170   : > { %v407_v23 = vpop.f32.mrb[0].mxu0 }
 0x171   : > { %v759_v24 = vpop.f32.mrb[1].mxu0  ;;  %v480_v25 = vpop.f32.mrb[0].mxu1 }
 0x172   : > { %v481_v26 = vadd.f32 %v480_v25, %v407_v23  ;;  %v770_v27 = vpop.f32.mrb[1].mxu1 }
 0x178   : > { %v559_v28 = vpop.f32.mrb[2].mxu0 }
 0x179   : > { %v563_v30 = vadd.f32 %v559_v28, %v481_v26  ;;  %v781_v31 = vpop.f32.mrb[3].mxu0 }
 0x17b   : > { %v571_v32 = vadd.f32 %v729_v29, %v563_v30 }
 0x17d   : > { %572 = vst [vmem:[%s325_s18] sm:$0xff] %v571_v32 }
 0x17e   : > { %1003 = shalt.err (!%p1000_p11)
}
 0x17f   : > { %s1004_s12 = scalar_lea.hbm %s1356_s23, 128  ;;  %s1008_s26 = scalar_lea.hbm %s1446_s10, 256 }
 0x180   : > { %p1005_p0 = scmp.ne.s32.totalorder %s1356_s23, %s1004_s12  ;;  %p1009_p8 = scmp.lt.u32.totalorder %s1356_s23, %s1446_s10 }
 0x181   : > { %p1010_p1 = scmp.lt.u32.totalorder %s1008_s26, %s1004_s12  ;;  %p1012_p4 = scmp.lt.u32.totalorder %s1004_s12, %s1356_s23 }
 0x182   : > { %p1006_p13 = pnand %p1005_p0, %p1447_p9 }
 0x183   : > { %p1011_p2 = por %p1010_p1, %p1009_p8 }
 0x184   : > { %p1007_p10 = pneg %p1006_p13 }
 0x185   : > { %p1013_p12 = por %p1012_p4, %p1011_p2 }
 0x187   : > { %p1014_p6 = pnand %p1013_p12, %p1007_p10 }
 0x189   : > { %1017 = shalt.err (!%p1014_p6)
}
 0x18a   : > { %810 = dma.vmem_to_hbm [thread:$0]  (%p1447_p9), %s1358_s22, 128, %s1356_s23, %s574_s24  }
 0x18b PF: > { %s1448_s1 = sld [smem:[#allocation15_spill]]  ;;  %s1449_s29 = sld [smem:[#allocation19_spill]] }
 0x18c   : > { %s1450_s11 = sld [smem:[#allocation16_spill]] }
 0x191   : > { %s599_s15 = sand.u32 1, %s1448_s1   ;;  %p1451_p3 = scmp.ne.s32.totalorder %s1449_s29, 0 }
 0x192   : > { %p1452_p5 = scmp.ge.s32.totalorder %s1450_s11, 2  ;;  %s600_s14 = scalar_lea.sflag [#allocation4], %s599_s15 }
 0x194   : > { %p827_p7 = pnand %p1452_p5, %p1451_p3 }
 0x196   : > { %1047 = dma.done.wait (!%p827_p7), %s600_s14, 128  }
 0x197   : > { %1049 = vsyncadd (!%p827_p7), %s600_s14, 4294967168  ;;  %s1453_s21 = sld [smem:[#allocation17_spill]]  ;;  %s1454_s5 = sld [smem:[#allocation18_spill]] }
 0x198   : > { %s1455_s18 = smov %s1056_s19  ;;  %s1456_s19 = smov %s1060_s20 }
 0x19d   : > { %p22_p11 = scmp.ge.s32.totalorder %s1453_s21, 4   ;;  %s1457_s20 = smov %s1454_s5 }
 0x19f   :  { %24 = sbr.rel (!%p22_p11) target bundleno = 11 (0xb), region = 115 }
 0x1a6   :  { %605 = vsyncpa [#allocation3], 1 }
 0x1a7   :  { %607 = vsyncpa [#allocation3 + $0x1], 1 }
 0x1a8   :  { %608 = vsyncpa [#allocation6], 1 }
 0x1a9   :  { %610 = vsyncpa [#allocation6 + $0x1], 1 }
 0x1aa   :  { %611 = vsyncpa [#allocation9], 1 }
 0x1ab   :  { %612 = vsyncpa [#allocation4], 1 }
 0x1ac   :  { %614 = vsyncpa [#allocation4 + $0x1], 1 }

</bundles_post_ra>
